<compile_context>
chip_gen: v7x
topology: tpu7x:2x2x1
jax: 0.10.0
libtpu: 0.0.40
codegen_flags: <defaults>
</compile_context>

<pallas_src>
import jax
import jax.numpy as jnp
from jax.experimental import pallas as pl
from jax.experimental.pallas import tpu as pltpu

HIDDEN = 256   # hidden width of the reference module (named BATCH_SIZE there)
K_PAD = 8      # sublane-padded observation dim (n_obs=4 -> 8, zero rows in w1)
N_PAD = 128    # lane-padded action dim (n_actions=2 -> 128, zero cols in w3)


def dqn_kernel(x_ref, w1_ref, b1_ref, w2_ref, b2_ref, w3_ref, b3_ref, o_ref):
    # layer1: Linear(n_obs_pad -> H) + ReLU   (bf16 MXU inputs, f32 accumulate)
    h = jnp.dot(x_ref[...].astype(jnp.bfloat16), w1_ref[...],
                preferred_element_type=jnp.float32)
    h = jnp.maximum(h + b1_ref[...], 0.0)
    # layer3: Linear(H -> H) + ReLU
    h = jnp.dot(h.astype(jnp.bfloat16), w2_ref[...],
                preferred_element_type=jnp.float32)
    h = jnp.maximum(h + b2_ref[...], 0.0)
    # layer4: Linear(H -> n_actions_pad), no activation; lane-dense 128-wide store
    out = jnp.dot(h.astype(jnp.bfloat16), w3_ref[...],
                  preferred_element_type=jnp.float32)
    o_ref[...] = (out + b3_ref[...]).astype(o_ref.dtype)


def dqn_forward(x, packed_params, n_actions, *, row_tile=256):
    """x: (B, n_obs) f32.  packed_params: padded bf16 weights + f32 biases."""
    w1, b1, w2, b2, w3, b3 = packed_params
    B, n_obs = x.shape
    k_pad, H = w1.shape
    n_pad = w3.shape[1]

    # Batch tiling: for large batches use 256-row tiles (matches the 2x256 MXU
    # on v6e/v7x and lets megacore shard rows across TensorCores); for small
    # batches a single 8-aligned tile avoids over-padding.
    if B >= row_tile:
        tb = row_tile
    else:
        tb = max(8, -(-B // 8) * 8)
    b_pad = -(-B // tb) * tb

    # Zero-pad batch rows and feature columns (zero w1 rows make it a no-op).
    x_p = jnp.zeros((b_pad, k_pad), jnp.float32).at[:B, :n_obs].set(x)

    grid = (b_pad // tb,)

    # Weights/biases stay VMEM-resident across batch tiles (constant index maps).
    def const(shape):
        return pl.BlockSpec(shape, lambda i, _s=shape: (0,) * len(_s))

    flops = 2 * b_pad * (k_pad * H + H * H + H * n_pad)
    bytes_accessed = (
        x_p.size * 4
        + (w1.size + w2.size + w3.size) * 2
        + (b1.size + b2.size + b3.size) * 4
        + b_pad * n_pad * 4
    )

    out = pl.pallas_call(
        dqn_kernel,
        out_shape=jax.ShapeDtypeStruct((b_pad, n_pad), jnp.float32),
        grid=grid,
        in_specs=[
            pl.BlockSpec((tb, k_pad), lambda i: (i, 0)),
            const(w1.shape), const(b1.shape),
            const(w2.shape), const(b2.shape),
            const(w3.shape), const(b3.shape),
        ],
        out_specs=pl.BlockSpec((tb, n_pad), lambda i: (i, 0)),
        compiler_params=pltpu.CompilerParams(
            dimension_semantics=("parallel",)),
        cost_estimate=pl.CostEstimate(
            flops=flops, transcendentals=0, bytes_accessed=bytes_accessed),
    )(x_p, w1, b1, w2, b2, w3, b3)

    return out[:B, :n_actions]


def init_params(key, n_observations, n_actions, hidden=HIDDEN):
    """Deterministic init mimicking PyTorch nn.Linear default U(-1/sqrt(fan_in), +)."""
    ks = jax.random.split(key, 6)

    def lin(kw, kb, fan_in, fan_out):
        bound = 1.0 / jnp.sqrt(fan_in)
        # stored as (in, out) so the kernel computes x @ W (== x @ W_torch.T)
        w = jax.random.uniform(kw, (fan_in, fan_out), jnp.float32, -bound, bound)
        b = jax.random.uniform(kb, (1, fan_out), jnp.float32, -bound, bound)
        return w, b

    w1, b1 = lin(ks[0], ks[1], n_observations, hidden)
    w2, b2 = lin(ks[2], ks[3], hidden, hidden)
    w3, b3 = lin(ks[4], ks[5], hidden, n_actions)
    return (w1, b1, w2, b2, w3, b3)


def pack_params(params, k_pad=K_PAD, n_pad=N_PAD):
    """Pad tiny dims (obs -> 8 sublanes, actions -> 128 lanes) and cast weights to bf16."""
    w1, b1, w2, b2, w3, b3 = params
    n_obs, H = w1.shape
    n_actions = w3.shape[1]
    w1_p = jnp.zeros((k_pad, H), jnp.bfloat16).at[:n_obs, :].set(w1.astype(jnp.bfloat16))
    w2_p = w2.astype(jnp.bfloat16)
    w3_p = jnp.zeros((H, n_pad), jnp.bfloat16).at[:, :n_actions].set(w3.astype(jnp.bfloat16))
    b3_p = jnp.zeros((1, n_pad), jnp.float32).at[:, :n_actions].set(b3)
    return (w1_p, b1, w2_p, b2, w3_p, b3_p)


def reference_forward(x, params, *, matmul_dtype=jnp.float32):
    """Pure-JAX reference; matmul_dtype=bfloat16 mirrors kernel precision exactly."""
    w1, b1, w2, b2, w3, b3 = params

    def d(a, b_):
        return jnp.dot(a.astype(matmul_dtype), b_.astype(matmul_dtype),
                       preferred_element_type=jnp.float32)

    h = jnp.maximum(d(x, w1) + b1, 0.0)
    h = jnp.maximum(d(h, w2) + b2, 0.0)
    return d(h, w3) + b3


if __name__ == "__main__":
    key = jax.random.PRNGKey(0)
    n_observations = 4   # CartPole observation dim
    n_actions = 2        # CartPole action dim
    batch = 8

    kx, kp, kx2 = jax.random.split(key, 3)
    x = jax.random.normal(kx, (batch, n_observations), jnp.float32)
    params = init_params(kp, n_observations, n_actions)
    packed = pack_params(params)

    out = dqn_forward(x, packed, n_actions)
    out = jax.block_until_ready(out)

    # Precision-matched reference (bf16 matmul inputs, f32 accumulation).
    ref_matched = reference_forward(x, params, matmul_dtype=jnp.bfloat16)
    # Full-f32 reference (original module semantics) with bf16-sized tolerance.
    ref_f32 = reference_forward(x, params, matmul_dtype=jnp.float32)

    assert out.shape == (batch, n_actions)
    assert jnp.allclose(out, ref_matched, atol=1e-3, rtol=1e-3)
    assert jnp.allclose(out, ref_f32, atol=3e-2, rtol=3e-2)

    # Exercise the multi-tile path (grid > 1, ragged batch padding) as well.
    x2 = jax.random.normal(kx2, (21, n_observations), jnp.float32)
    out2 = jax.block_until_ready(dqn_forward(x2, packed, n_actions, row_tile=8))
    ref2 = reference_forward(x2, params, matmul_dtype=jnp.bfloat16)
    assert out2.shape == (21, n_actions)
    assert jnp.allclose(out2, ref2, atol=1e-3, rtol=1e-3)

    print("KERNEL_OK")
</pallas_src>

<mosaic_0001>
module attributes {stable_mosaic.version = 11 : i64} {
  func.func @dqn_kernel(%arg0: i32, %arg1: memref<8x8xf32, #tpu.memory_space<vmem>>, %arg2: memref<8x256xbf16, #tpu.memory_space<vmem>>, %arg3: memref<1x256xf32, #tpu.memory_space<vmem>>, %arg4: memref<256x256xbf16, #tpu.memory_space<vmem>>, %arg5: memref<1x256xf32, #tpu.memory_space<vmem>>, %arg6: memref<256x128xbf16, #tpu.memory_space<vmem>>, %arg7: memref<1x128xf32, #tpu.memory_space<vmem>>, %arg8: memref<8x128xf32, #tpu.memory_space<vmem>>) attributes {dimension_semantics = [#tpu.dimension_semantics<parallel>], iteration_bounds = array<i64: 1>, scalar_prefetch = 0 : i64, scratch_operands = 0 : i64, tpu.core_type = #tpu.core_type<tc>, window_params = [{transform_indices = @transform_0, window_bounds = array<i64: 8, 8>}, {pipeline_mode = #tpu.pipeline_mode<synchronous>, transform_indices = @transform_1, window_bounds = array<i64: 8, 256>}, {pipeline_mode = #tpu.pipeline_mode<synchronous>, transform_indices = @transform_2, window_bounds = array<i64: 1, 256>}, {pipeline_mode = #tpu.pipeline_mode<synchronous>, transform_indices = @transform_3, window_bounds = array<i64: 256, 256>}, {pipeline_mode = #tpu.pipeline_mode<synchronous>, transform_indices = @transform_4, window_bounds = array<i64: 1, 256>}, {pipeline_mode = #tpu.pipeline_mode<synchronous>, transform_indices = @transform_5, window_bounds = array<i64: 256, 128>}, {pipeline_mode = #tpu.pipeline_mode<synchronous>, transform_indices = @transform_6, window_bounds = array<i64: 1, 128>}, {transform_indices = @transform_7, window_bounds = array<i64: 8, 128>}]} {
    %c0 = arith.constant 0 : index
    %c0_0 = arith.constant 0 : index
    %0 = vector.load %arg1[%c0, %c0_0] : memref<8x8xf32, #tpu.memory_space<vmem>>, vector<8x8xf32>
    %1 = arith.truncf %0 : vector<8x8xf32> to vector<8x8xbf16>
    %c0_1 = arith.constant 0 : index
    %c0_2 = arith.constant 0 : index
    %2 = vector.load %arg2[%c0_1, %c0_2] : memref<8x256xbf16, #tpu.memory_space<vmem>>, vector<8x256xbf16>
    %cst = arith.constant dense<0.000000e+00> : vector<8x256xf32>
    %3 = tpu.matmul %1, %2, %cst {dimension_numbers = #tpu.dot_dimension_numbers<[1], [0], [0], [1], [0, 0, 1, 1], [], []>} : vector<8x8xbf16>, vector<8x256xbf16>, vector<8x256xf32> -> vector<8x256xf32>
    %c0_3 = arith.constant 0 : index
    %c0_4 = arith.constant 0 : index
    %4 = vector.load %arg3[%c0_3, %c0_4] : memref<1x256xf32, #tpu.memory_space<vmem>>, vector<1x256xf32>
    %5 = vector.broadcast %4 : vector<1x256xf32> to vector<8x256xf32>
    %6 = arith.addf %3, %5 : vector<8x256xf32>
    %cst_5 = arith.constant 0.000000e+00 : f32
    %7 = vector.broadcast %cst_5 : f32 to vector<8x256xf32>
    %8 = arith.maximumf %6, %7 : vector<8x256xf32>
    %9 = arith.truncf %8 : vector<8x256xf32> to vector<8x256xbf16>
    %c0_6 = arith.constant 0 : index
    %c0_7 = arith.constant 0 : index
    %10 = vector.load %arg4[%c0_6, %c0_7] : memref<256x256xbf16, #tpu.memory_space<vmem>>, vector<256x256xbf16>
    %cst_8 = arith.constant dense<0.000000e+00> : vector<8x256xf32>
    %11 = tpu.matmul %9, %10, %cst_8 {dimension_numbers = #tpu.dot_dimension_numbers<[1], [0], [0], [1], [0, 0, 1, 1], [], []>} : vector<8x256xbf16>, vector<256x256xbf16>, vector<8x256xf32> -> vector<8x256xf32>
    %c0_9 = arith.constant 0 : index
    %c0_10 = arith.constant 0 : index
    %12 = vector.load %arg5[%c0_9, %c0_10] : memref<1x256xf32, #tpu.memory_space<vmem>>, vector<1x256xf32>
    %13 = vector.broadcast %12 : vector<1x256xf32> to vector<8x256xf32>
    %14 = arith.addf %11, %13 : vector<8x256xf32>
    %cst_11 = arith.constant 0.000000e+00 : f32
    %15 = vector.broadcast %cst_11 : f32 to vector<8x256xf32>
    %16 = arith.maximumf %14, %15 : vector<8x256xf32>
    %17 = arith.truncf %16 : vector<8x256xf32> to vector<8x256xbf16>
    %c0_12 = arith.constant 0 : index
    %c0_13 = arith.constant 0 : index
    %18 = vector.load %arg6[%c0_12, %c0_13] : memref<256x128xbf16, #tpu.memory_space<vmem>>, vector<256x128xbf16>
    %cst_14 = arith.constant dense<0.000000e+00> : vector<8x128xf32>
    %19 = tpu.matmul %17, %18, %cst_14 {dimension_numbers = #tpu.dot_dimension_numbers<[1], [0], [0], [1], [0, 0, 1, 1], [], []>} : vector<8x256xbf16>, vector<256x128xbf16>, vector<8x128xf32> -> vector<8x128xf32>
    %c0_15 = arith.constant 0 : index
    %c0_16 = arith.constant 0 : index
    %20 = vector.load %arg7[%c0_15, %c0_16] : memref<1x128xf32, #tpu.memory_space<vmem>>, vector<1x128xf32>
    %21 = vector.broadcast %20 : vector<1x128xf32> to vector<8x128xf32>
    %22 = arith.addf %19, %21 : vector<8x128xf32>
    %c0_17 = arith.constant 0 : index
    %c0_18 = arith.constant 0 : index
    %23 = vector.load %arg8[%c0_17, %c0_18] : memref<8x128xf32, #tpu.memory_space<vmem>>, vector<8x128xf32>
    tpu.vector_store %arg8[%c0_17, %c0_18], %22 {strides = array<i32>} : memref<8x128xf32, #tpu.memory_space<vmem>>, vector<8x128xf32>,
    return
  }
  func.func @transform_0(%arg0: i32) -> (i32, i32) {
    %c0_i32 = arith.constant 0 : i32
    %c0_i32_0 = arith.constant 0 : i32
    return %arg0, %c0_i32 : i32, i32
  }
  func.func @transform_1(%arg0: i32) -> (i32, i32) {
    %c0_i32 = arith.constant 0 : i32
    %c0_i32_0 = arith.constant 0 : i32
    %c0_i32_1 = arith.constant 0 : i32
    return %c0_i32, %c0_i32_0 : i32, i32
  }
  func.func @transform_2(%arg0: i32) -> (i32, i32) {
    %c0_i32 = arith.constant 0 : i32
    %c0_i32_0 = arith.constant 0 : i32
    %c0_i32_1 = arith.constant 0 : i32
    return %c0_i32, %c0_i32_0 : i32, i32
  }
  func.func @transform_3(%arg0: i32) -> (i32, i32) {
    %c0_i32 = arith.constant 0 : i32
    %c0_i32_0 = arith.constant 0 : i32
    %c0_i32_1 = arith.constant 0 : i32
    return %c0_i32, %c0_i32_0 : i32, i32
  }
  func.func @transform_4(%arg0: i32) -> (i32, i32) {
    %c0_i32 = arith.constant 0 : i32
    %c0_i32_0 = arith.constant 0 : i32
    %c0_i32_1 = arith.constant 0 : i32
    return %c0_i32, %c0_i32_0 : i32, i32
  }
  func.func @transform_5(%arg0: i32) -> (i32, i32) {
    %c0_i32 = arith.constant 0 : i32
    %c0_i32_0 = arith.constant 0 : i32
    %c0_i32_1 = arith.constant 0 : i32
    return %c0_i32, %c0_i32_0 : i32, i32
  }
  func.func @transform_6(%arg0: i32) -> (i32, i32) {
    %c0_i32 = arith.constant 0 : i32
    %c0_i32_0 = arith.constant 0 : i32
    %c0_i32_1 = arith.constant 0 : i32
    return %c0_i32, %c0_i32_0 : i32, i32
  }
  func.func @transform_7(%arg0: i32) -> (i32, i32) {
    %c0_i32 = arith.constant 0 : i32
    %c0_i32_0 = arith.constant 0 : i32
    return %arg0, %c0_i32 : i32, i32
  }
}

</mosaic_0001>

<bundles_post_ra>
// kernel: tpu_custom_call.1
= control target key start
LH: loop header
LB: loop body
LE: loop exit
PB: predicated region body
PF: predicated region fallthrough
CT: control target
= control target key end

     0   :  { %12 = vsyncpa [#allocation3], 0  ;;  %s985_s0 = inlined_call_operand.hbm [shape: f32[8,8], index: 0, kind: input, shape index: {}]   ;;  %s986_s1 = inlined_call_operand.hbm [shape: bf16[8,256], index: 1, kind: input, shape index: {}]   ;;  %s987_s2 = inlined_call_operand.vmem [shape: f32[1,256], index: 2, kind: input, shape index: {}]   ;;  %s988_s3 = inlined_call_operand.hbm [shape: bf16[256,256], index: 3, kind: input, shape index: {}]   ;;  %s989_s4 = inlined_call_operand.vmem [shape: f32[1,256], index: 4, kind: input, shape index: {}]   ;;  %s990_s5 = inlined_call_operand.hbm [shape: bf16[256,128], index: 5, kind: input, shape index: {}]   ;;  %s991_s6 = inlined_call_operand.vmem [shape: f32[1,128], index: 6, kind: input, shape index: {}]   ;;  %s992_s7 = inlined_call_operand.hbm [shape: f32[8,128], index: 7, kind: output, shape index: {}]  }
   0x1   :  { %13 = vsyncpa [#allocation6], 0 }
   0x2   :  { %14 = vsyncpa [#allocation9], 0 }
   0x3   :  { %15 = vsyncpa [#allocation4], 0  ;;  %s866_s24 = smov [#allocation5]   ;;  %s867_s26 = smov [#allocation2]  }
   0x4   :  { %s32_s25 = sshll.u32 %s866_s24, 4  ;;  %s22_s27 = sshll.u32 %s867_s26, 4  ;;  %s33_s25 = int_to_ptr.vmem [resolvable:$true] %s32_s25  ;;  %s23_s27 = int_to_ptr.vmem [resolvable:$true] %s22_s27 }
   0x5   :  { %s748_s30 = scalar_lea.hbm %s986_s1, 128 }
   0x6   :  { %p749_p0 = scmp.ne.s32.totalorder %s986_s1, %s748_s30  ;;  %p752_p1 = scmp.lt.u32.totalorder %s748_s30, %s986_s1 }
   0x8   :  { %p754_p2 = pnand %p752_p1, %p749_p0 }
   0xa   :  { %757 = shalt.err (!%p754_p2)
}
   0xb   :  { %s758_s12 = scalar_lea.vmem %s33_s25, 128  ;;  %p763_p4 = scmp.lt.s32.totalorder %s33_s25, %s33_s25 }
   0xc   :  { %p759_p3 = scmp.ne.s32.totalorder %s33_s25, %s758_s12  ;;  %p764_p5 = scmp.lt.s32.totalorder %s758_s12, %s758_s12 }
   0xe   :  { %p765_p6 = por %p764_p5, %p763_p4 }
  0x10   :  { %p766_p7 = pnand %p765_p6, %p759_p3 }
  0x12   :  { %769 = shalt.err (!%p766_p7)
}
  0x13   :  { %35 = dma.hbm_to_vmem [thread:$0]  %s986_s1, 128, %s33_s25, [#allocation6]  }
  0x14   :  { %s770_s17 = scalar_lea.hbm %s985_s0, 128 }
  0x15   :  { %p771_p8 = scmp.ne.s32.totalorder %s985_s0, %s770_s17  ;;  %p774_p9 = scmp.lt.u32.totalorder %s770_s17, %s985_s0 }
  0x17   :  { %p776_p10 = pnand %p774_p9, %p771_p8 }
  0x19   :  { %779 = shalt.err (!%p776_p10)
}
  0x1a   :  { %s780_s22 = scalar_lea.vmem %s23_s27, 128  ;;  %p785_p12 = scmp.lt.s32.totalorder %s23_s27, %s23_s27 }
  0x1b   :  { %p781_p11 = scmp.ne.s32.totalorder %s23_s27, %s780_s22  ;;  %p786_p13 = scmp.lt.s32.totalorder %s780_s22, %s780_s22 }
  0x1d   :  { %p787_p0 = por %p786_p13, %p785_p12 }
  0x1f   :  { %p788_p1 = pnand %p787_p0, %p781_p11 }
  0x21   :  { %791 = shalt.err (!%p788_p1)
}
  0x22   :  { %25 = dma.hbm_to_vmem [thread:$0]  %s985_s0, 128, %s23_s27, [#allocation3]  }
  0x23   :  { %s868_s24 = smov [#allocation7]   ;;  %s792_s29 = scalar_lea.hbm %s988_s3, 4096 }
  0x24   :  { %s43_s25 = sshll.u32 %s868_s24, 4  ;;  %p793_p2 = scmp.ne.s32.totalorder %s988_s3, %s792_s29  ;;  %s44_s25 = int_to_ptr.vmem [resolvable:$true] %s43_s25 }
  0x25   :  { %p796_p3 = scmp.lt.u32.totalorder %s792_s29, %s988_s3 }
  0x27   :  { %p798_p4 = pnand %p796_p3, %p793_p2 }
  0x29   :  { %801 = shalt.err (!%p798_p4)
}
  0x2a   :  { %s802_s11 = scalar_lea.vmem %s44_s25, 4096  ;;  %p807_p6 = scmp.lt.s32.totalorder %s44_s25, %s44_s25 }
  0x2b   :  { %p803_p5 = scmp.ne.s32.totalorder %s44_s25, %s802_s11  ;;  %p808_p7 = scmp.lt.s32.totalorder %s802_s11, %s802_s11 }
  0x2d   :  { %p809_p8 = por %p808_p7, %p807_p6 }
  0x2f   :  { %p810_p9 = pnand %p809_p8, %p803_p5 }
  0x31   :  { %813 = shalt.err (!%p810_p9)
}
  0x32   :  { %s869_s0 = smov 128   ;;  %s870_s27 = smov 8  }
  0x33   :  { %49 = dma.hbm_to_vmem [thread:$0]  %s988_s3, 4096, %s44_s25, [#allocation6], %s869_s0, %s869_s0, %s870_s27  }
  0x34   :  { %s871_s14 = smov [#allocation8]   ;;  %s814_s18 = scalar_lea.hbm %s990_s5, 2048 }
  0x35   :  { %s57_s15 = sshll.u32 %s871_s14, 4  ;;  %p815_p10 = scmp.ne.s32.totalorder %s990_s5, %s814_s18  ;;  %s58_s15 = int_to_ptr.vmem [resolvable:$true] %s57_s15 }
  0x36   :  { %p818_p11 = scmp.lt.u32.totalorder %s814_s18, %s990_s5 }
  0x38   :  { %p820_p12 = pnand %p818_p11, %p815_p10 }
  0x3a   :  { %823 = shalt.err (!%p820_p12)
}
  0x3b   :  { %s824_s1 = scalar_lea.vmem %s58_s15, 2048  ;;  %p829_p0 = scmp.lt.s32.totalorder %s58_s15, %s58_s15 }
  0x3c   :  { %p825_p13 = scmp.ne.s32.totalorder %s58_s15, %s824_s1  ;;  %p830_p1 = scmp.lt.s32.totalorder %s824_s1, %s824_s1 }
  0x3e   :  { %p831_p2 = por %p830_p1, %p829_p0 }
  0x40   :  { %p832_p3 = pnand %p831_p2, %p825_p13 }
  0x42   :  { %835 = shalt.err (!%p832_p3)
}
  0x43   :  { %s872_s3 = smov 64   ;;  %s873_s23 = smov 4  }
  0x44   :  { %63 = dma.hbm_to_vmem [thread:$0]  %s990_s5, 2048, %s58_s15, [#allocation9], %s872_s3, %s872_s3, %s873_s23  }
  0x45   :  { %858 = dma.done.wait [#allocation3], 128  }
  0x46   :  { %859 = vsyncadd [#allocation3], 4294967168 }
  0x47   :  { %860 = dma.done.wait [#allocation6], 4224  }
  0x48   :  { %861 = vsyncadd [#allocation6], 4294963072 }
  0x49   :  { %862 = dma.done.wait [#allocation9], 2048  }
  0x4a   :  { %863 = vsyncadd [#allocation9], 4294965248  ;;  %v874_v0 = vmov 0   ;;  %v81_v1 = vld [vmem:[#allocation5] sm:$0xff]  ;;  %vm103_vm0 = vcmask 1043456   ;;  %v79_v2 = vld [vmem:[#allocation2] sm:$0xff]  ;;  %v84_v51 = vlaneseq }
  0x4b   :  { %142 = vmatprep.mubr.bf16.mxu0 %v874_v0  ;;  %v598_v3 = vcombine.high %v81_v1, %v81_v1  ;;  %v597_v4 = vcombine.low %v81_v1, %v81_v1  ;;  %v684_v5 = vld [vmem:[#allocation7 + $0x4] ss:$8 sps:$4 sm:$0xff]   ;;  %v686_v6 = vld [vmem:[#allocation7] ss:$8 sps:$4 sm:$0xff]   ;;  %v687_v7 = vld [vmem:[#allocation7 + $0x14] ss:$8 sps:$4 sm:$0xff]   ;;  %v80_v9 = vpack.c.bf16 %v79_v2, %v79_v2 }
  0x4c   :  { %359 = vmatprep.subr.bf16.mxu1 %v684_v5  ;;  %vm99_vm1 = vcmask 64512   ;;  %v689_v10 = vld [vmem:[#allocation7 + $0x10] ss:$8 sps:$4 sm:$0xff]   ;;  %v690_v11 = vld [vmem:[#allocation7 + $0x24] ss:$8 sps:$4 sm:$0xff]   ;;  %v85_v52 = vshrl.u32 %v84_v51, 7 }
  0x4d   :  { %599 = vmatprep.subr.msk.bf16.mxu0 %vm103_vm0, %v598_v3  ;;  %v105_v8 = vsel %vm103_vm0, %v597_v4, 0  ;;  %360 = vmatpush1.bf16.msra.mxu1 %v686_v6  ;;  %v692_v12 = vld [vmem:[#allocation7 + $0x20] ss:$8 sps:$4 sm:$0xff]   ;;  %v693_v13 = vld [vmem:[#allocation7 + $0x34] ss:$8 sps:$4 sm:$0xff]  }
  0x4e   :  { %111 = vmatpush1.bf16.msra.mxu0 %v105_v8  ;;  %361 = vmatprep.subr.bf16.mxu1 %v687_v7  ;;  %v695_v14 = vld [vmem:[#allocation7 + $0x30] ss:$8 sps:$4 sm:$0xff]   ;;  %v696_v15 = vld [vmem:[#allocation7 + $0x44] ss:$8 sps:$4 sm:$0xff]   ;;  %v698_v16 = vld [vmem:[#allocation7 + $0x40] ss:$8 sps:$4 sm:$0xff]  }
  0x4f   :  { %v699_v17 = vld [vmem:[#allocation7 + $0x54] ss:$8 sps:$4 sm:$0xff]   ;;  %v701_v18 = vld [vmem:[#allocation7 + $0x50] ss:$8 sps:$4 sm:$0xff]   ;;  %v702_v19 = vld [vmem:[#allocation7 + $0x64] ss:$8 sps:$4 sm:$0xff]  }
  0x50   :  { %v704_v20 = vld [vmem:[#allocation7 + $0x60] ss:$8 sps:$4 sm:$0xff]   ;;  %v705_v21 = vld [vmem:[#allocation7 + $0x74] ss:$8 sps:$4 sm:$0xff]   ;;  %v707_v22 = vld [vmem:[#allocation7 + $0x70] ss:$8 sps:$4 sm:$0xff]  }
  0x51   :  { %600 = vmatmul.mubr.msk.bf16.vlgmr.msra.gmra.mrb[0].mxu0 %vm99_vm1, %v80_v9  ;;  %362 = vmatpush1.bf16.msra.mxu1 %v689_v10  ;;  %v708_v23 = vld [vmem:[#allocation7 + $0x84] ss:$8 sps:$4 sm:$0xff]   ;;  %v710_v24 = vld [vmem:[#allocation7 + $0x80] ss:$8 sps:$4 sm:$0xff]   ;;  %v711_v25 = vld [vmem:[#allocation7 + $0x94] ss:$8 sps:$4 sm:$0xff]  }
  0x52   :  { %363 = vmatprep.subr.bf16.mxu1 %v690_v11  ;;  %v713_v26 = vld [vmem:[#allocation7 + $0x90] ss:$8 sps:$4 sm:$0xff]   ;;  %v714_v27 = vld [vmem:[#allocation7 + $0xa4] ss:$8 sps:$4 sm:$0xff]   ;;  %v716_v28 = vld [vmem:[#allocation7 + $0xa0] ss:$8 sps:$4 sm:$0xff]  }
  0x53   :  { %v717_v29 = vld [vmem:[#allocation7 + $0xb4] ss:$8 sps:$4 sm:$0xff]   ;;  %v719_v30 = vld [vmem:[#allocation7 + $0xb0] ss:$8 sps:$4 sm:$0xff]   ;;  %v720_v31 = vld [vmem:[#allocation7 + $0xc4] ss:$8 sps:$4 sm:$0xff]  }
  0x54   :  { %v722_v32 = vld [vmem:[#allocation7 + $0xc0] ss:$8 sps:$4 sm:$0xff]   ;;  %v723_v33 = vld [vmem:[#allocation7 + $0xd4] ss:$8 sps:$4 sm:$0xff]   ;;  %v725_v34 = vld [vmem:[#allocation7 + $0xd0] ss:$8 sps:$4 sm:$0xff]  }
  0x55   :  { %364 = vmatpush1.bf16.msra.mxu1 %v692_v12  ;;  %v726_v35 = vld [vmem:[#allocation7 + $0xe4] ss:$8 sps:$4 sm:$0xff]   ;;  %v728_v36 = vld [vmem:[#allocation7 + $0xe0] ss:$8 sps:$4 sm:$0xff]   ;;  %v729_v37 = vld [vmem:[#allocation7 + $0xf4] ss:$8 sps:$4 sm:$0xff]  }
  0x56   :  { %365 = vmatprep.subr.bf16.mxu1 %v693_v13  ;;  %v731_v38 = vld [vmem:[#allocation7 + $0xf0] ss:$8 sps:$4 sm:$0xff]   ;;  %v732_v39 = vld [vmem:[#allocation8 + $0x40] sm:$0xff]   ;;  %v734_v41 = vld [vmem:[#allocation8 + $0x48] sm:$0xff]   ;;  %v86_v53 = vsub.s32 0, %v85_v52  ;;  %v90_v55 = vsub.s32 1, %v85_v52 }
  0x57   :  { %v733_v40 = vld [vmem:[#allocation8] sm:$0xff]   ;;  %650 = vmatprep.subr.bf16.mxu0 %v732_v39  ;;  %v735_v42 = vld [vmem:[#allocation8 + $0x8] sm:$0xff]   ;;  %v736_v43 = vld [vmem:[#allocation8 + $0x50] sm:$0xff]  }
  0x58   :  { %651 = vmatpush3.bf16.msra.mxu0 %v733_v40  ;;  %v737_v44 = vld [vmem:[#allocation8 + $0x10] sm:$0xff]   ;;  %v738_v45 = vld [vmem:[#allocation8 + $0x58] sm:$0xff]   ;;  %v740_v47 = vld [vmem:[#allocation8 + $0x60] sm:$0xff]  }
  0x59   :  { %366 = vmatpush1.bf16.msra.mxu1 %v695_v14  ;;  %652 = vmatprep.subr.bf16.mxu0 %v734_v41  ;;  %v739_v46 = vld [vmem:[#allocation8 + $0x18] sm:$0xff]   ;;  %v741_v48 = vld [vmem:[#allocation8 + $0x20] sm:$0xff]   ;;  %v742_v49 = vld [vmem:[#allocation8 + $0x68] sm:$0xff]  }
  0x5a   :  { %367 = vmatprep.subr.bf16.mxu1 %v696_v15  ;;  %v743_v50 = vld [vmem:[#allocation8 + $0x28] sm:$0xff]   ;;  %v82_v54 = vld [vmem:[%s987_s2] sm:$0x3]  ;;  %v746_v6 = vld [vmem:[#allocation8 + $0x78] sm:$0xff]  }
  0x5b   :  { %v87_v56 = vrot.slane %v82_v54, %v86_v53  ;;  %v91_v57 = vrot.slane %v82_v54, %v90_v55  ;;  %v744_v4 = vld [vmem:[#allocation8 + $0x70] sm:$0xff]   ;;  %v747_v7 = vld [vmem:[#allocation8 + $0x38] sm:$0xff]  }
  0x5c   :  { %653 = vmatpush3.bf16.msra.mxu0 %v735_v42  ;;  %v745_v5 = vld [vmem:[#allocation8 + $0x30] sm:$0xff]  }
  0x5d   :  { %368 = vmatpush1.bf16.msra.mxu1 %v698_v16  ;;  %654 = vmatprep.subr.bf16.mxu0 %v736_v43  ;;  %v187_v8 = vld [vmem:[%s989_s4] sm:$0x3]  ;;  %s875_s4 = smov [#allocation10]  }
  0x5e   :  { %369 = vmatprep.subr.bf16.mxu1 %v699_v17  ;;  %v192_v9 = vrot.slane %v187_v8, %v86_v53  ;;  %v196_v10 = vrot.slane %v187_v8, %v90_v55  ;;  %s586_s8 = sshll.u32 %s875_s4, 4  ;;  %s587_s8 = int_to_ptr.vmem [resolvable:$true] %s586_s8 }
  0x5f   :  { %s836_s9 = scalar_lea.vmem %s587_s8, 128  ;;  %p841_p5 = scmp.lt.s32.totalorder %s587_s8, %s587_s8 }
  0x60   :  { %655 = vmatpush3.bf16.msra.mxu0 %v737_v44  ;;  %p837_p4 = scmp.ne.s32.totalorder %s587_s8, %s836_s9  ;;  %p842_p6 = scmp.lt.s32.totalorder %s836_s9, %s836_s9 }
  0x61   :  { %370 = vmatpush1.bf16.msra.mxu1 %v701_v18  ;;  %656 = vmatprep.subr.bf16.mxu0 %v738_v45 }
  0x62   :  { %371 = vmatprep.subr.bf16.mxu1 %v702_v19  ;;  %p843_p7 = por %p842_p6, %p841_p5 }
  0x64   :  { %657 = vmatpush3.bf16.msra.mxu0 %v739_v46  ;;  %p844_p8 = pnand %p843_p7, %p837_p4 }
  0x65   :  { %372 = vmatpush1.bf16.msra.mxu1 %v704_v20  ;;  %658 = vmatprep.subr.bf16.mxu0 %v740_v47 }
  0x66   :  { %373 = vmatprep.subr.bf16.mxu1 %v705_v21 }
  0x68   :  { %659 = vmatpush3.bf16.msra.mxu0 %v741_v48 }
  0x69   :  { %374 = vmatpush1.bf16.msra.mxu1 %v707_v22  ;;  %660 = vmatprep.subr.bf16.mxu0 %v742_v49  ;;  %v633_v22 = vld [vmem:[%s991_s6] ss:$0 sm:$0xff] }
  0x6a   :  { %375 = vmatprep.subr.bf16.mxu1 %v708_v23 }
  0x6c   :  { %661 = vmatpush3.bf16.msra.mxu0 %v743_v50 }
  0x6d   :  { %376 = vmatpush1.bf16.msra.mxu1 %v710_v24  ;;  %662 = vmatprep.subr.bf16.mxu0 %v744_v4 }
  0x6e   :  { %377 = vmatprep.subr.bf16.mxu1 %v711_v25 }
  0x70   :  { %663 = vmatpush3.bf16.msra.mxu0 %v745_v5 }
  0x71   :  { %378 = vmatpush1.bf16.msra.mxu1 %v713_v26  ;;  %664 = vmatprep.subr.bf16.mxu0 %v746_v6 }
  0x72   :  { %379 = vmatprep.subr.bf16.mxu1 %v714_v27 }
  0x74   :  { %665 = vmatpush3.bf16.msra.mxu0 %v747_v7 }
  0x75   :  { %380 = vmatpush1.bf16.msra.mxu1 %v716_v28 }
  0x76   :  { %381 = vmatprep.subr.bf16.mxu1 %v717_v29 }
  0x79   :  { %382 = vmatpush1.bf16.msra.mxu1 %v719_v30 }
  0x7a   :  { %383 = vmatprep.subr.bf16.mxu1 %v720_v31 }
  0x7d   :  { %384 = vmatpush1.bf16.msra.mxu1 %v722_v32 }
  0x7e   :  { %385 = vmatprep.subr.bf16.mxu1 %v723_v33 }
  0x81   :  { %386 = vmatpush1.bf16.msra.mxu1 %v725_v34 }
  0x82   :  { %387 = vmatprep.subr.bf16.mxu1 %v726_v35 }
  0x85   :  { %388 = vmatpush1.bf16.msra.mxu1 %v728_v36 }
  0x86   :  { %389 = vmatprep.subr.bf16.mxu1 %v729_v37 }
  0x89   :  { %390 = vmatpush1.bf16.msra.mxu1 %v731_v38 }
 0x124   :  { %v144_v58 = vpop.f32.mrb[0].mxu0 }
 0x125   :  { %v145_v59 = vadd.f32 %v144_v58, %v87_v56  ;;  %v146_v60 = vpop.f32.mrb[1].mxu0 }
 0x126   :  { %v147_v61 = vadd.f32 %v146_v60, %v91_v57  ;;  %v148_v62 = vpop.f32.mrb[2].mxu0 }
 0x127   :  { %v151_v63 = vmax.f32 %v145_v59, 0.0  ;;  %v149_v0 = vpop.f32.mrb[3].mxu0 }
 0x128   :  { %v152_v1 = vmax.f32 %v147_v61, 0.0 }
 0x129   :  { %v153_v3 = vpack.c.bf16 %v151_v63, %v151_v63 }
 0x12a   :  { %v154_v2 = vpack.c.bf16 %v152_v1, %v152_v1 }
 0x12c   :  { %391 = vmatprep.mubr.bf16.mxu1 %v154_v2 }
 0x12d   :  { %392 = vmatmul.mubr.bf16.vlgmr.msra.gmra.mrb[0].mxu1 %v153_v3 }
 0x200   :  { %v393_v11 = vpop.f32.mrb[0].mxu1 }
 0x201   :  { %v394_v12 = vadd.f32 %v393_v11, %v192_v9  ;;  %v395_v13 = vpop.f32.mrb[1].mxu1 }
 0x202   :  { %v396_v14 = vadd.f32 %v395_v13, %v196_v10  ;;  %v397_v15 = vpop.f32.mrb[2].mxu1 }
 0x203   :  { %v400_v16 = vmax.f32 %v394_v12, 0.0  ;;  %v398_v17 = vpop.f32.mrb[3].mxu1 }
 0x204   :  { %v401_v18 = vmax.f32 %v396_v14, 0.0 }
 0x205   :  { %v402_v20 = vpack.c.bf16 %v400_v16, %v400_v16 }
 0x206   :  { %v403_v19 = vpack.c.bf16 %v401_v18, %v401_v18 }
 0x208   :  { %571 = vmatprep.mubr.bf16.mxu0 %v403_v19 }
 0x209   :  { %572 = vmatmul.mubr.bf16.vlgmr.msra.gmra.mrb[4].mxu0 %v402_v20 }
 0x2dc   :  { %v666_v21 = vpop.f32.mrb[4].mxu0 }
 0x2dd   :  { %v667_v23 = vpop.f32.mrb[5].mxu0 }
 0x2de   :  { %v668_v24 = vadd.f32 %v667_v23, %v666_v21  ;;  %v669_v25 = vpop.f32.mrb[6].mxu0 }
 0x2df   :  { %v670_v26 = vpop.f32.mrb[7].mxu0 }
 0x2e0   :  { %v574_v27 = vadd.f32 %v668_v24, %v633_v22 }
 0x2e2   :  { %579 = vst [vmem:[#allocation10] sm:$0xff] %v574_v27 }
 0x2e3   :  { %847 = shalt.err (!%p844_p8)
}
 0x2e4   :  { %s848_s6 = scalar_lea.hbm %s992_s7, 128 }
 0x2e5   :  { %p849_p9 = scmp.ne.s32.totalorder %s992_s7, %s848_s6  ;;  %p852_p10 = scmp.lt.u32.totalorder %s848_s6, %s992_s7 }
 0x2e7   :  { %p854_p11 = pnand %p852_p10, %p849_p9 }
 0x2e9   :  { %857 = shalt.err (!%p854_p11)
}
 0x2ea   :  { %589 = dma.vmem_to_hbm [thread:$0]  %s587_s8, 128, %s992_s7, [#allocation4]  }
 0x2eb   :  { %864 = dma.done.wait [#allocation4], 128  }
 0x2ec   :  { %865 = vsyncadd [#allocation4], 4294967168 }
 0x2ed   :  { %593 = vsyncpa [#allocation3], 1 }
 0x2ee   :  { %594 = vsyncpa [#allocation6], 1 }
 0x2ef   :  { %595 = vsyncpa [#allocation9], 1 }
 0x2f0   :  { %596 = vsyncpa [#allocation4], 1 }

</bundles_post_ra>
